<compile_context>
chip_gen: v6e
topology: v6e:2x2x1
jax: 0.10.0
libtpu: 0.0.40
codegen_flags: <defaults>
</compile_context>

<pallas_src>
import functools

import numpy as np

import jax
import jax.numpy as jnp
from jax.experimental import pallas as pl
from jax.experimental.pallas import tpu as pltpu


# ----------------------------------------------------------------------------
# Pallas kernel: one output tile = frames_tile @ windowed-DFT-basis on the MXU.
# Works for both layouts (basis tile or whole resident basis).
# ----------------------------------------------------------------------------
def _stft_matmul_kernel(frames_ref, basis_ref, out_ref):
    out_ref[...] = jnp.dot(
        frames_ref[...], basis_ref[...], preferred_element_type=jnp.float32
    )


# ----------------------------------------------------------------------------
# Host-side (trace-time) constants.
# ----------------------------------------------------------------------------
def hann_window_np(n):
    # torch.hann_window default (periodic): 0.5 - 0.5*cos(2*pi*k/N)
    k = np.arange(n, dtype=np.float64)
    return 0.5 - 0.5 * np.cos(2.0 * np.pi * k / n)


def make_windowed_dft_basis(window, n_fft, lane_multiple=128):
    """Windowed real-DFT basis, float32, columns interleaved [re_k, im_k],
    zero-padded to a multiple of `lane_multiple` columns.

    X[k] = sum_n w[n] x[n] e^{-2*pi*i*k*n/N}  ->  basis[:, 2k]   = w*cos,
                                                  basis[:, 2k+1] = -w*sin.
    Built in numpy float64 with exact integer angle reduction.
    lane_multiple=128 keeps padding minimal for the VMEM-resident layout;
    use 256/512 if the column-tiled fallback layout is the common case.
    """
    window = np.asarray(window, dtype=np.float64)
    assert window.shape == (n_fft,), "module assumes window_length == n_fft"
    n_bins = n_fft // 2 + 1
    n = np.arange(n_fft)
    k = np.arange(n_bins)
    # Exact reduction of n*k mod n_fft in integers before the trig call.
    ang = (2.0 * np.pi / n_fft) * ((n[:, None] * k[None, :]) % n_fft)
    re = window[:, None] * np.cos(ang)          # (n_fft, n_bins)
    im = -window[:, None] * np.sin(ang)         # (n_fft, n_bins)
    basis = np.stack([re, im], axis=-1).reshape(n_fft, 2 * n_bins)  # interleaved
    n_cols = 2 * n_bins
    n_pad = ((n_cols + lane_multiple - 1) // lane_multiple) * lane_multiple
    if n_pad > n_cols:
        basis = np.pad(basis, ((0, 0), (0, n_pad - n_cols)))
    return basis.astype(np.float32)             # (n_fft, N_pad)


def _pick_col_tile(n_pad, max_tn=512):
    """Largest multiple of 128 that divides n_pad and is <= max_tn."""
    groups = n_pad // 128
    best = 1
    for d in range(1, groups + 1):
        if groups % d == 0 and d * 128 <= max_tn:
            best = d
    return best * 128


# ----------------------------------------------------------------------------
# STFT wrapper.
# ----------------------------------------------------------------------------
@functools.partial(
    jax.jit,
    static_argnames=("n_fft", "n_hop", "center", "compute_dtype", "tm",
                     "max_tn", "resident_budget_bytes"),
)
def stft_pallas(x, basis_w, *, n_fft, n_hop, center=True,
                compute_dtype=jnp.bfloat16, tm=256, max_tn=512,
                resident_budget_bytes=56 * 1024 * 1024):
    """x: (B, C, T) float32, basis_w: (n_fft, N_pad) float32 (windowed basis).
    Returns (B, C, n_fft//2+1, n_frames, 2) float32 (torch.stft layout)."""
    B, C, T = x.shape
    n_bins = n_fft // 2 + 1
    N_pad = basis_w.shape[1]

    # --- glue: reshape + reflect pad (torch.stft center=True semantics) -----
    xf = x.reshape(B * C, T).astype(jnp.float32)
    if center:
        pad = n_fft // 2
        xf = jnp.pad(xf, ((0, 0), (pad, pad)), mode="reflect")
    padded_len = xf.shape[1]
    n_frames = 1 + (padded_len - n_fft) // n_hop

    M = B * C * n_frames
    M_pad = ((M + tm - 1) // tm) * tm

    # --- frame gather, built directly at the padded row count.  Rows >= M
    #     repeat the last valid frame and are sliced off after the kernel.
    # TODO(synk): move this gather in-kernel (slab DMA + strided pl.ds reads)
    # to avoid materializing the expanded frames matrix in HBM.
    rows = jnp.minimum(jnp.arange(M_pad), M - 1)
    bc = rows // n_frames
    start = (rows % n_frames) * n_hop
    gather_idx = start[:, None] + jnp.arange(n_fft)[None, :]
    frames = xf[bc[:, None], gather_idx].astype(compute_dtype)   # (M_pad, n_fft)

    basis = basis_w.astype(compute_dtype)                        # (n_fft, N_pad)

    itemsize = jnp.dtype(compute_dtype).itemsize
    flops = 2 * M_pad * n_fft * N_pad

    basis_bytes = n_fft * N_pad * itemsize
    # Resident layout: basis single-buffered (memory_space=VMEM), frames and
    # output tiles double-buffered by the pipeline, plus some slack.
    resident_vmem = (basis_bytes
                     + 2 * tm * n_fft * itemsize
                     + 2 * tm * N_pad * 4
                     + (2 << 20))
    use_resident = resident_vmem <= resident_budget_bytes

    if use_resident:
        # 1-D grid over frame-row tiles; basis is VMEM-resident and read from
        # HBM exactly once.  "parallel" lets v7x megacore shard row tiles
        # (each TC holds its own copy of the basis).
        grid = (M_pad // tm,)
        in_specs = [
            pl.BlockSpec((tm, n_fft), lambda i: (i, 0)),                 # frames
            pl.BlockSpec(memory_space=pltpu.MemorySpace.VMEM),           # basis
        ]
        out_specs = pl.BlockSpec((tm, N_pad), lambda i: (i, 0))
        dims = ("parallel",)
        vmem_limit = int(min(max(resident_vmem, 16 << 20), 100 << 20))
        bytes_accessed = (M_pad * n_fft * itemsize      # frames read once
                          + basis_bytes                 # basis read once
                          + M_pad * N_pad * 4)          # output write
    else:
        # Fallback 2-D grid: column tiles OUTER so the (large) basis is
        # streamed from HBM once and only the frames matrix is re-streamed.
        tn = _pick_col_tile(N_pad, max_tn)
        grid = (N_pad // tn, M_pad // tm)
        in_specs = [
            pl.BlockSpec((tm, n_fft), lambda j, i: (i, 0)),              # frames
            pl.BlockSpec((n_fft, tn), lambda j, i: (0, j)),              # basis
        ]
        out_specs = pl.BlockSpec((tm, tn), lambda j, i: (i, j))
        dims = ("parallel", "parallel")
        tiled_vmem = (2 * (tm * n_fft * itemsize
                           + n_fft * tn * itemsize
                           + tm * tn * 4)
                      + (2 << 20))
        vmem_limit = int(min(max(tiled_vmem, 16 << 20), 100 << 20))
        bytes_accessed = ((N_pad // tn) * M_pad * n_fft * itemsize   # frames re-read
                          + basis_bytes                              # basis once
                          + M_pad * N_pad * 4)                       # output write

    out = pl.pallas_call(
        _stft_matmul_kernel,
        out_shape=jax.ShapeDtypeStruct((M_pad, N_pad), jnp.float32),
        grid=grid,
        in_specs=in_specs,
        out_specs=out_specs,
        compiler_params=pltpu.CompilerParams(
            dimension_semantics=dims,
            vmem_limit_bytes=vmem_limit,
        ),
        cost_estimate=pl.CostEstimate(
            flops=flops, transcendentals=0, bytes_accessed=bytes_accessed
        ),
    )(frames, basis)

    # Columns are interleaved [re_k, im_k]; drop row/column padding, reshape,
    # then one transpose to the torch.stft layout (B, C, n_bins, n_frames, 2).
    # TODO(synk): this transpose could move in-kernel (XLU tile transpose +
    # bins-major out_specs) to save one HBM round trip of the output.
    out = out[:M, : 2 * n_bins].reshape(B, C, n_frames, n_bins, 2)
    return jnp.transpose(out, (0, 1, 3, 2, 4))


# ----------------------------------------------------------------------------
# Pure-JAX reference (rfft) mirroring torch.stft semantics.
# ----------------------------------------------------------------------------
def stft_reference(x, window, *, n_fft, n_hop, center=True):
    B, C, T = x.shape
    xf = x.reshape(B * C, T).astype(jnp.float32)
    if center:
        pad = n_fft // 2
        xf = jnp.pad(xf, ((0, 0), (pad, pad)), mode="reflect")
    n_frames = 1 + (xf.shape[1] - n_fft) // n_hop
    idx = jnp.arange(n_frames)[:, None] * n_hop + jnp.arange(n_fft)[None, :]
    frames = xf[:, idx] * window[None, None, :]      # (B*C, n_frames, n_fft)
    spec = jnp.fft.rfft(frames, n=n_fft, axis=-1)    # (B*C, n_frames, n_bins)
    spec = spec.reshape(B, C, n_frames, -1)
    out = jnp.stack([spec.real, spec.imag], axis=-1)
    return jnp.transpose(out, (0, 1, 3, 2, 4))       # (B, C, n_bins, n_frames, 2)


if __name__ == "__main__":
    # Small, shape-consistent config (window_length == n_fft as the module assumes).
    n_fft = 32
    n_hop = 8
    B, C, T = 2, 2, 128

    key = jax.random.PRNGKey(0)
    x = jax.random.normal(key, (B, C, T), dtype=jnp.float32)

    window_np = hann_window_np(n_fft)                       # fixed "parameter"
    basis_w = jnp.asarray(make_windowed_dft_basis(window_np, n_fft))
    window = jnp.asarray(window_np, dtype=jnp.float32)

    ref = stft_reference(x, window, n_fft=n_fft, n_hop=n_hop, center=True)
    ref = jax.block_until_ready(ref)
    scale = max(1.0, float(jnp.max(jnp.abs(ref))))
    expected_shape = (B, C, n_fft // 2 + 1, 1 + T // n_hop, 2)

    # 1) Production path: VMEM-resident basis, bf16 operands, f32 MXU accum.
    out = stft_pallas(x, basis_w, n_fft=n_fft, n_hop=n_hop, center=True,
                      compute_dtype=jnp.bfloat16)
    out = jax.block_until_ready(out)
    assert out.shape == expected_shape, out.shape
    err_bf16 = float(jnp.max(jnp.abs(out - ref)))
    # Relative to spectrum scale: bf16 operand quantization over K=n_fft.
    assert err_bf16 <= 3e-2 * scale, (err_bf16, scale)

    # 2) Exactness check: same resident layout with f32 operands.
    out_f32 = stft_pallas(x, basis_w, n_fft=n_fft, n_hop=n_hop, center=True,
                          compute_dtype=jnp.float32)
    out_f32 = jax.block_until_ready(out_f32)
    err_f32 = float(jnp.max(jnp.abs(out_f32 - ref)))
    assert err_f32 <= 2e-3 * scale, (err_f32, scale)

    # 3) Force the column-tiled fallback layout (resident budget 0) to make
    #    sure the non-resident path also compiles and is correct.
    out_tiled = stft_pallas(x, basis_w, n_fft=n_fft, n_hop=n_hop, center=True,
                            compute_dtype=jnp.bfloat16, resident_budget_bytes=0)
    out_tiled = jax.block_until_ready(out_tiled)
    err_tiled = float(jnp.max(jnp.abs(out_tiled - ref)))
    assert err_tiled <= 3e-2 * scale, (err_tiled, scale)

    print("KERNEL_OK")
</pallas_src>

<mosaic_0001>
module attributes {stable_mosaic.version = 11 : i64} {
  func.func @_stft_matmul_kernel(%arg0: i32, %arg1: memref<256x32xbf16, #tpu.memory_space<vmem>>, %arg2: memref<32x128xbf16, #tpu.memory_space<vmem>>, %arg3: memref<256x128xf32, #tpu.memory_space<vmem>>) attributes {dimension_semantics = [#tpu.dimension_semantics<parallel>], iteration_bounds = array<i64: 1>, scalar_prefetch = 0 : i64, scratch_operands = 0 : i64, tpu.core_type = #tpu.core_type<tc>, window_params = [{transform_indices = @transform_0, window_bounds = array<i64: 256, 32>}, {pipeline_mode = #tpu.pipeline_mode<synchronous>, transform_indices = @transform_1, window_bounds = array<i64: 32, 128>}, {transform_indices = @transform_2, window_bounds = array<i64: 256, 128>}]} {
    %c0 = arith.constant 0 : index
    %c0_0 = arith.constant 0 : index
    %0 = vector.load %arg1[%c0, %c0_0] : memref<256x32xbf16, #tpu.memory_space<vmem>>, vector<256x32xbf16>
    %c0_1 = arith.constant 0 : index
    %c0_2 = arith.constant 0 : index
    %1 = vector.load %arg2[%c0_1, %c0_2] : memref<32x128xbf16, #tpu.memory_space<vmem>>, vector<32x128xbf16>
    %cst = arith.constant dense<0.000000e+00> : vector<256x128xf32>
    %2 = tpu.matmul %0, %1, %cst {dimension_numbers = #tpu.dot_dimension_numbers<[1], [0], [0], [1], [0, 0, 1, 1], [], []>} : vector<256x32xbf16>, vector<32x128xbf16>, vector<256x128xf32> -> vector<256x128xf32>
    %c0_3 = arith.constant 0 : index
    %c0_4 = arith.constant 0 : index
    %3 = vector.load %arg3[%c0_3, %c0_4] : memref<256x128xf32, #tpu.memory_space<vmem>>, vector<256x128xf32>
    tpu.vector_store %arg3[%c0_3, %c0_4], %2 {strides = array<i32>} : memref<256x128xf32, #tpu.memory_space<vmem>>, vector<256x128xf32>,
    return
  }
  func.func @transform_0(%arg0: i32) -> (i32, i32) {
    %c0_i32 = arith.constant 0 : i32
    %c0_i32_0 = arith.constant 0 : i32
    return %arg0, %c0_i32 : i32, i32
  }
  func.func @transform_1(%arg0: i32) -> (i32, i32) {
    %c0_i32 = arith.constant 0 : i32
    %c0_i32_0 = arith.constant 0 : i32
    %c0_i32_1 = arith.constant 0 : i32
    return %c0_i32, %c0_i32_0 : i32, i32
  }
  func.func @transform_2(%arg0: i32) -> (i32, i32) {
    %c0_i32 = arith.constant 0 : i32
    %c0_i32_0 = arith.constant 0 : i32
    return %arg0, %c0_i32 : i32, i32
  }
}

</mosaic_0001>

<bundles_post_ra>
// kernel: stft_pallas.1
= control target key start
LH: loop header
LB: loop body
LE: loop exit
PB: predicated region body
PF: predicated region fallthrough
CT: control target
= control target key end

     0   :  { %vm140_vm0 = vcmask 261120   ;;  %s677_s1 = inlined_call_operand.vmem [shape: bf16[32,128], index: 1, kind: input, shape index: {}]   ;;  %s678_s0 = inlined_call_operand.vmem [shape: bf16[256,32], index: 0, kind: input, shape index: {}]   ;;  %s679_s2 = inlined_call_operand.vmem [shape: f32[256,128], index: 2, kind: output, shape index: {}]  }
   0x1   :  { %v478_v0 = vld [vmem:[%s677_s1 + $0x8] sm:$0xff]   ;;  %v479_v1 = vld [vmem:[%s677_s1] sm:$0xff]   ;;  %v484_v6 = vld [vmem:[%s678_s0 + $0x10] sm:$0xff]  }
   0x2   :  { %438 = vmatprep.subr.bf16.mxu0 %v478_v0  ;;  %474 = vmatprep.subr.bf16.mxu1 %v478_v0  ;;  %v480_v2 = vld [vmem:[%s678_s0] sm:$0xff]   ;;  %v482_v4 = vld [vmem:[%s678_s0 + $0x8] sm:$0xff]   ;;  %v485_v7 = vld [vmem:[%s678_s0 + $0x50] sm:$0xff]  }
   0x3   :  { %439 = vmatpush3.bf16.msra.mxu0 %v478_v0  ;;  %476 = vmatpush3.bf16.msra.mxu1 %v478_v0  ;;  %v481_v3 = vld [vmem:[%s678_s0 + $0x40] sm:$0xff]   ;;  %v483_v5 = vld [vmem:[%s678_s0 + $0x48] sm:$0xff]   ;;  %v486_v8 = vld [vmem:[%s678_s0 + $0x18] sm:$0xff]  }
   0x4   :  { %440 = vmatprep.subr.bf16.mxu0 %v479_v1  ;;  %475 = vmatprep.subr.bf16.mxu1 %v479_v1  ;;  %v487_v9 = vld [vmem:[%s678_s0 + $0x58] sm:$0xff]   ;;  %v488_v10 = vld [vmem:[%s678_s0 + $0x20] sm:$0xff]   ;;  %v490_v12 = vld [vmem:[%s678_s0 + $0x28] sm:$0xff]  }
   0x5   :  { %442 = vmatprep.mubr.msk.bf16.mxu0 %vm140_vm0, %v480_v2  ;;  %458 = vmatprep.mubr.msk.bf16.mxu1 %vm140_vm0, %v481_v3  ;;  %v489_v11 = vld [vmem:[%s678_s0 + $0x60] sm:$0xff]   ;;  %v491_v13 = vld [vmem:[%s678_s0 + $0x68] sm:$0xff]   ;;  %v492_v14 = vld [vmem:[%s678_s0 + $0x30] sm:$0xff]  }
   0x6   :  { %v493_v15 = vld [vmem:[%s678_s0 + $0x70] sm:$0xff]   ;;  %v494_v16 = vld [vmem:[%s678_s0 + $0x38] sm:$0xff]  }
   0x7   :  { %441 = vmatpush3.bf16.msra.mxu0 %v479_v1  ;;  %477 = vmatpush3.bf16.msra.mxu1 %v479_v1  ;;  %v495_v17 = vld [vmem:[%s678_s0 + $0x78] sm:$0xff]  }
   0xa   :  { %443 = vmatmul.mubr.msk.bf16.vlgmr.msra.gmra.mxu0 %vm140_vm0, %v482_v4  ;;  %459 = vmatmul.mubr.msk.bf16.vlgmr.msra.gmra.mxu1 %vm140_vm0, %v483_v5 }
   0xb   :  { %446 = vmatprep.mubr.msk.bf16.mxu0 %vm140_vm0, %v484_v6  ;;  %462 = vmatprep.mubr.msk.bf16.mxu1 %vm140_vm0, %v485_v7 }
  0x12   :  { %447 = vmatmul.mubr.msk.bf16.gmra.mxu0 %vm140_vm0, %v486_v8  ;;  %463 = vmatmul.mubr.msk.bf16.gmra.mxu1 %vm140_vm0, %v487_v9 }
  0x13   :  { %450 = vmatprep.mubr.msk.bf16.mxu0 %vm140_vm0, %v488_v10  ;;  %466 = vmatprep.mubr.msk.bf16.mxu1 %vm140_vm0, %v489_v11 }
  0x1a   :  { %451 = vmatmul.mubr.msk.bf16.gmra.mxu0 %vm140_vm0, %v490_v12  ;;  %467 = vmatmul.mubr.msk.bf16.gmra.mxu1 %vm140_vm0, %v491_v13 }
  0x1b   :  { %454 = vmatprep.mubr.msk.bf16.mxu0 %vm140_vm0, %v492_v14  ;;  %470 = vmatprep.mubr.msk.bf16.mxu1 %vm140_vm0, %v493_v15 }
  0x22   :  { %455 = vmatmul.mubr.msk.bf16.gmra.mxu0 %vm140_vm0, %v494_v16  ;;  %471 = vmatmul.mubr.msk.bf16.gmra.mxu1 %vm140_vm0, %v495_v17 }
  0xca   :  { %v444_v18 = vpop.f32.mrf.mxu0  ;;  %v460_v19 = vpop.f32.mrf.mxu1 }
  0xcb   :  { %352 = vst [vmem:[%s679_s2 + $0x10] sm:$0xff] %v444_v18  ;;  %368 = vst [vmem:[%s679_s2 + $0x90] sm:$0xff] %v460_v19 }
  0xcc   :  { %v223_v20 = vpop.f32.mrf.mxu0  ;;  %v287_v21 = vpop.f32.mrf.mxu1 }
  0xcd   :  { %350 = vst [vmem:[%s679_s2] sm:$0xff] %v223_v20  ;;  %366 = vst [vmem:[%s679_s2 + $0x80] sm:$0xff] %v287_v21 }
  0xce   :  { %v445_v22 = vpop.f32.mrf.mxu0  ;;  %v461_v23 = vpop.f32.mrf.mxu1 }
  0xcf   :  { %353 = vst [vmem:[%s679_s2 + $0x18] sm:$0xff] %v445_v22  ;;  %369 = vst [vmem:[%s679_s2 + $0x98] sm:$0xff] %v461_v23 }
  0xd0   :  { %v226_v24 = vpop.f32.mrf.mxu0  ;;  %v290_v25 = vpop.f32.mrf.mxu1 }
  0xd1   :  { %351 = vst [vmem:[%s679_s2 + $0x8] sm:$0xff] %v226_v24  ;;  %367 = vst [vmem:[%s679_s2 + $0x88] sm:$0xff] %v290_v25 }
  0xd2   :  { %v448_v26 = vpop.f32.mrf.mxu0  ;;  %v464_v27 = vpop.f32.mrf.mxu1 }
  0xd3   :  { %356 = vst [vmem:[%s679_s2 + $0x30] sm:$0xff] %v448_v26  ;;  %372 = vst [vmem:[%s679_s2 + $0xb0] sm:$0xff] %v464_v27 }
  0xd4   :  { %v239_v28 = vpop.f32.mrf.mxu0  ;;  %v303_v29 = vpop.f32.mrf.mxu1 }
  0xd5   :  { %354 = vst [vmem:[%s679_s2 + $0x20] sm:$0xff] %v239_v28  ;;  %370 = vst [vmem:[%s679_s2 + $0xa0] sm:$0xff] %v303_v29 }
  0xd6   :  { %v449_v30 = vpop.f32.mrf.mxu0  ;;  %v465_v31 = vpop.f32.mrf.mxu1 }
  0xd7   :  { %357 = vst [vmem:[%s679_s2 + $0x38] sm:$0xff] %v449_v30  ;;  %373 = vst [vmem:[%s679_s2 + $0xb8] sm:$0xff] %v465_v31 }
  0xd8   :  { %v242_v32 = vpop.f32.mrf.mxu0  ;;  %v306_v33 = vpop.f32.mrf.mxu1 }
  0xd9   :  { %355 = vst [vmem:[%s679_s2 + $0x28] sm:$0xff] %v242_v32  ;;  %371 = vst [vmem:[%s679_s2 + $0xa8] sm:$0xff] %v306_v33 }
  0xda   :  { %v452_v34 = vpop.f32.mrf.mxu0  ;;  %v468_v35 = vpop.f32.mrf.mxu1 }
  0xdb   :  { %360 = vst [vmem:[%s679_s2 + $0x50] sm:$0xff] %v452_v34  ;;  %376 = vst [vmem:[%s679_s2 + $0xd0] sm:$0xff] %v468_v35 }
  0xdc   :  { %v255_v36 = vpop.f32.mrf.mxu0  ;;  %v319_v37 = vpop.f32.mrf.mxu1 }
  0xdd   :  { %358 = vst [vmem:[%s679_s2 + $0x40] sm:$0xff] %v255_v36  ;;  %374 = vst [vmem:[%s679_s2 + $0xc0] sm:$0xff] %v319_v37 }
  0xde   :  { %v453_v38 = vpop.f32.mrf.mxu0  ;;  %v469_v39 = vpop.f32.mrf.mxu1 }
  0xdf   :  { %361 = vst [vmem:[%s679_s2 + $0x58] sm:$0xff] %v453_v38  ;;  %377 = vst [vmem:[%s679_s2 + $0xd8] sm:$0xff] %v469_v39 }
  0xe0   :  { %v258_v40 = vpop.f32.mrf.mxu0  ;;  %v322_v41 = vpop.f32.mrf.mxu1 }
  0xe1   :  { %359 = vst [vmem:[%s679_s2 + $0x48] sm:$0xff] %v258_v40  ;;  %375 = vst [vmem:[%s679_s2 + $0xc8] sm:$0xff] %v322_v41 }
  0xe2   :  { %v456_v42 = vpop.f32.mrf.mxu0  ;;  %v472_v43 = vpop.f32.mrf.mxu1 }
  0xe3   :  { %364 = vst [vmem:[%s679_s2 + $0x70] sm:$0xff] %v456_v42  ;;  %380 = vst [vmem:[%s679_s2 + $0xf0] sm:$0xff] %v472_v43 }
  0xe4   :  { %v271_v44 = vpop.f32.mrf.mxu0  ;;  %v335_v45 = vpop.f32.mrf.mxu1 }
  0xe5   :  { %362 = vst [vmem:[%s679_s2 + $0x60] sm:$0xff] %v271_v44  ;;  %378 = vst [vmem:[%s679_s2 + $0xe0] sm:$0xff] %v335_v45 }
  0xe6   :  { %v457_v46 = vpop.f32.mrf.mxu0  ;;  %v473_v47 = vpop.f32.mrf.mxu1 }
  0xe7   :  { %365 = vst [vmem:[%s679_s2 + $0x78] sm:$0xff] %v457_v46  ;;  %381 = vst [vmem:[%s679_s2 + $0xf8] sm:$0xff] %v473_v47 }
  0xe8   :  { %v274_v48 = vpop.f32.mrf.mxu0  ;;  %v338_v49 = vpop.f32.mrf.mxu1 }
  0xe9   :  { %363 = vst [vmem:[%s679_s2 + $0x68] sm:$0xff] %v274_v48  ;;  %379 = vst [vmem:[%s679_s2 + $0xe8] sm:$0xff] %v338_v49 }

</bundles_post_ra>
